<compile_context>
chip_gen: v6e
topology: v6e:2x2x1
jax: 0.10.0
libtpu: 0.0.40
codegen_flags: <defaults>
</compile_context>

<pallas_src>
import jax
import jax.numpy as jnp
from jax.experimental import pallas as pl
from jax.experimental.pallas import tpu as pltpu


def _round_up(x, m):
    return ((x + m - 1) // m) * m


def _block_diag(mats):
    rows = sum(m.shape[0] for m in mats)
    cols = sum(m.shape[1] for m in mats)
    out = jnp.zeros((rows, cols), mats[0].dtype)
    r = c = 0
    for m in mats:
        out = out.at[r:r + m.shape[0], c:c + m.shape[1]].set(m)
        r += m.shape[0]
        c += m.shape[1]
    return out


def _pad2d(a, rows, cols):
    return jnp.pad(a, ((0, rows - a.shape[0]), (0, cols - a.shape[1])))


def _pick_tile(padded_hw, cap, want_blocks):
    """Largest multiple of 128 dividing padded_hw, <= cap, and (if possible)
    leaving >= want_blocks blocks along the pixel axis."""
    nb = padded_hw // 128
    tiles = [d * 128 for d in range(1, nb + 1) if nb % d == 0]
    ok = [t for t in tiles if t <= cap and padded_hw // t >= want_blocks]
    if not ok:
        ok = [t for t in tiles if t <= cap] or [128]
    return max(ok)


def _make_heads_kernel(fused_dims, n_tasks, dim_out, chunk, n_chunks):
    """Kernel over one (1, C, TILE) channel-major pixel tile, all tasks fused."""
    n_layers = len(fused_dims)

    def kernel(x_ref, w_ref, b_ref, *o_refs):
        # Tiny fused weights/biases: loaded once per grid step, VMEM resident.
        ws = [w_ref[li, :fused_dims[li][0], :fused_dims[li][1]]
              for li in range(n_layers)]
        bs = [b_ref[li, :fused_dims[li][0], :] for li in range(n_layers)]

        # Chunk the pixel (lane) axis so intermediates stay ~(T*C/2, chunk)
        # even when the DMA tile is thousands of lanes wide.
        for c in range(n_chunks):
            lo = c * chunk
            h = x_ref[0, :, lo:lo + chunk]                      # (C, chunk)
            for li in range(n_layers):
                h = jnp.dot(ws[li], h,
                            preferred_element_type=jnp.float32) + bs[li]
                if li < n_layers - 1:
                    h = jnp.maximum(h, 0.0)
            # h: (n_tasks*dim_out, chunk) -> lane-dense per-task stores.
            for t in range(n_tasks):
                o_refs[t][0, :, lo:lo + chunk] = (
                    h[t * dim_out:(t + 1) * dim_out, :].astype(o_refs[t].dtype))

    return kernel


def ablation_task_heads_forward(x_nchw, heads_params, *, tile_hw=4096):
    """x_nchw: (N, C, H, W) float32.
    heads_params: {task: [(w (out,in), b (out,1)), ...]} per 1x1-conv layer.
    Returns {task: (N, dim_out, H, W)} matching the PyTorch module.
    """
    N, C, H, W = x_nchw.shape
    tasks = list(heads_params.keys())
    n_tasks = len(tasks)
    n_layers = len(heads_params[tasks[0]])
    # All tasks must share layer shapes (true for AblationTaskHeads).
    ref_shapes = [(w.shape, b.shape) for w, b in heads_params[tasks[0]]]
    for t in tasks:
        assert [(w.shape, b.shape) for w, b in heads_params[t]] == ref_shapes, t
    dim_out = heads_params[tasks[0]][-1][0].shape[0]
    HW = H * W

    # ---- fuse all task heads: concat (layer 0) / block-diag (layers 1..) ----
    fused_ws, fused_bs, fused_dims = [], [], []
    for li in range(n_layers):
        w_t = [heads_params[t][li][0] for t in tasks]
        b_t = [heads_params[t][li][1] for t in tasks]
        W_f = jnp.concatenate(w_t, axis=0) if li == 0 else _block_diag(w_t)
        B_f = jnp.concatenate(b_t, axis=0)
        fused_ws.append(W_f)
        fused_bs.append(B_f)
        fused_dims.append(W_f.shape)
    p_out = max(w.shape[0] for w in fused_ws)
    p_in = max(w.shape[1] for w in fused_ws)
    w_pack = jnp.stack([_pad2d(w, p_out, p_in) for w in fused_ws])   # (L,Po,Pi)
    b_pack = jnp.stack([_pad2d(b, p_out, 1) for b in fused_bs])      # (L,Po,1)

    # ---- tile selection: 128-aligned padding only; tile divides padded_hw ----
    padded_hw = _round_up(HW, 128)
    weight_bytes = (w_pack.size + b_pack.size) * 4
    # Conservative budget that fits even v5e's 16 MiB default scoped VMEM and
    # v7x's 64 MiB physical VMEM; x and outputs are double-buffered.
    vmem_budget = max((12 << 20) - 2 * weight_bytes, 2 << 20)
    bytes_per_lane = 2 * 4 * (C + n_tasks * dim_out)
    cap = max(128, min(tile_hw, (vmem_budget // bytes_per_lane) // 128 * 128))
    want_blocks = 2 if N == 1 else 1          # keep both v7x TensorCores busy
    tile = _pick_tile(padded_hw, cap, want_blocks)
    chunk = 512 if tile % 512 == 0 else (256 if tile % 256 == 0 else 128)

    x = x_nchw.reshape(N, C, HW)              # channel-major already (NCHW)
    if padded_hw != HW:                       # rare: HW not a multiple of 128
        x = jnp.pad(x, ((0, 0), (0, 0), (0, padded_hw - HW)))

    grid = (N, padded_hw // tile)
    x_spec = pl.BlockSpec((1, C, tile), lambda n, p: (n, 0, p))
    w_spec = pl.BlockSpec(w_pack.shape, lambda n, p: (0, 0, 0))
    b_spec = pl.BlockSpec(b_pack.shape, lambda n, p: (0, 0, 0))
    out_specs = [pl.BlockSpec((1, dim_out, tile), lambda n, p: (n, 0, p))
                 for _ in tasks]
    out_shapes = tuple(jax.ShapeDtypeStruct((N, dim_out, padded_hw), jnp.float32)
                       for _ in tasks)

    per_task_dims = [C] + [heads_params[tasks[0]][li][0].shape[0]
                           for li in range(n_layers)]
    flops = 2 * N * HW * n_tasks * sum(per_task_dims[i] * per_task_dims[i + 1]
                                       for i in range(n_layers))
    bytes_accessed = 4 * N * padded_hw * (C + n_tasks * dim_out) + weight_bytes

    outs = pl.pallas_call(
        _make_heads_kernel(fused_dims, n_tasks, dim_out, chunk, tile // chunk),
        out_shape=out_shapes,
        grid_spec=pltpu.PrefetchScalarGridSpec(
            num_scalar_prefetch=0,
            grid=grid,
            in_specs=[x_spec, w_spec, b_spec],
            out_specs=out_specs,
        ),
        compiler_params=pltpu.CompilerParams(
            dimension_semantics=("parallel", "parallel"),
            vmem_limit_bytes=32 * 1024 * 1024),
        cost_estimate=pl.CostEstimate(flops=flops, transcendentals=0,
                                      bytes_accessed=bytes_accessed),
    )(x, w_pack, b_pack)

    result = {}
    for t, o in zip(tasks, outs):
        if padded_hw != HW:
            o = o[:, :, :HW]
        result[t] = o.reshape(N, dim_out, H, W)
    return result


def make_head_params(key, n_features_in, dim_out=3):
    """Synthetic params mirroring the PyTorch head shapes.

    Conv2d(kernel=1) weight (out, in, 1, 1) is stored here as (out, in);
    bias (out,) stored as (out, 1) for lane broadcast in channel-major compute.
    """
    dims = [n_features_in,
            n_features_in // 2,
            n_features_in // 4,
            n_features_in // 8,
            dim_out]
    params = []
    for li in range(4):
        kin, kout = dims[li], dims[li + 1]
        kw, kb, key = jax.random.split(key, 3)
        bound = 1.0 / jnp.sqrt(kin)  # PyTorch default uniform init bound
        w = jax.random.uniform(kw, (kout, kin), jnp.float32, -bound, bound)
        b = jax.random.uniform(kb, (kout, 1), jnp.float32, -bound, bound)
        params.append((w, b))
    return params


def _reference_forward(x_nchw, heads_params):
    """Pure-JAX reference (same math, no Pallas) for verification."""
    N, C, H, W = x_nchw.shape
    x = x_nchw.reshape(N, C, H * W)
    outs = {}
    for task, params in heads_params.items():
        h = x
        for li, (w, b) in enumerate(params):
            h = jnp.einsum('oi,nip->nop', w, h) + b[None]
            if li < len(params) - 1:
                h = jnp.maximum(h, 0.0)
        outs[task] = h.reshape(N, -1, H, W)
    return outs


if __name__ == "__main__":
    key = jax.random.PRNGKey(0)

    def run_case(n_features_in, tasks, N, H, W, kseed):
        kx, kp = jax.random.split(jax.random.fold_in(key, kseed))
        x = jax.random.normal(kx, (N, n_features_in, H, W), jnp.float32)
        heads_params = {
            t: make_head_params(jax.random.fold_in(kp, i), n_features_in, dim_out=3)
            for i, t in enumerate(tasks)
        }
        out = ablation_task_heads_forward(x, heads_params)
        out = jax.tree_util.tree_map(jax.block_until_ready, out)
        ref = _reference_forward(x, heads_params)
        for t in tasks:
            assert out[t].shape == (N, 3, H, W), (t, out[t].shape)
            assert jnp.allclose(out[t], ref[t], atol=1e-4, rtol=1e-4), t

    # Aligned case: HW multiple of 128 -> zero wrapper-side pad/slice copies.
    run_case(32, ("depth", "normals"), N=2, H=16, W=16, kseed=0)
    # Ragged case: HW=169 -> padded to 256, tail sliced off; N=1 forces >=2
    # pixel blocks for megacore balance.
    run_case(32, ("depth", "normals", "albedo"), N=1, H=13, W=13, kseed=1)

    print("KERNEL_OK")
</pallas_src>

<mosaic_0001>
module attributes {stable_mosaic.version = 11 : i64} {
  func.func @kernel(%arg0: i32, %arg1: i32, %arg2: memref<1x32x256xf32, #tpu.memory_space<vmem>>, %arg3: memref<4x32x32xf32, #tpu.memory_space<vmem>>, %arg4: memref<4x32x1xf32, #tpu.memory_space<vmem>>, %arg5: memref<1x3x256xf32, #tpu.memory_space<vmem>>, %arg6: memref<1x3x256xf32, #tpu.memory_space<vmem>>) attributes {dimension_semantics = [#tpu.dimension_semantics<parallel>, #tpu.dimension_semantics<parallel>], iteration_bounds = array<i64: 2, 1>, scalar_prefetch = 0 : i64, scratch_operands = 0 : i64, tpu.core_type = #tpu.core_type<tc>, window_params = [{transform_indices = @transform_0, window_bounds = array<i64: 1, 32, 256>}, {pipeline_mode = #tpu.pipeline_mode<synchronous>, transform_indices = @transform_1, window_bounds = array<i64: 4, 32, 32>}, {pipeline_mode = #tpu.pipeline_mode<synchronous>, transform_indices = @transform_2, window_bounds = array<i64: 4, 32, 1>}, {transform_indices = @transform_3, window_bounds = array<i64: 1, 3, 256>}, {transform_indices = @transform_4, window_bounds = array<i64: 1, 3, 256>}]} {
    %c0 = arith.constant 0 : index
    %c0_0 = arith.constant 0 : index
    %c0_1 = arith.constant 0 : index
    %0 = vector.load %arg3[%c0, %c0_0, %c0_1] : memref<4x32x32xf32, #tpu.memory_space<vmem>>, vector<1x32x32xf32>
    %1 = vector.shape_cast %0 : vector<1x32x32xf32> to vector<32x32xf32>
    %c1 = arith.constant 1 : index
    %c0_2 = arith.constant 0 : index
    %c0_3 = arith.constant 0 : index
    %2 = vector.load %arg3[%c1, %c0_2, %c0_3] : memref<4x32x32xf32, #tpu.memory_space<vmem>>, vector<1x16x32xf32>
    %3 = vector.shape_cast %2 : vector<1x16x32xf32> to vector<16x32xf32>
    %c2 = arith.constant 2 : index
    %c0_4 = arith.constant 0 : index
    %c0_5 = arith.constant 0 : index
    %4 = vector.load %arg3[%c2, %c0_4, %c0_5] : memref<4x32x32xf32, #tpu.memory_space<vmem>>, vector<1x8x16xf32>
    %5 = vector.shape_cast %4 : vector<1x8x16xf32> to vector<8x16xf32>
    %c3 = arith.constant 3 : index
    %c0_6 = arith.constant 0 : index
    %c0_7 = arith.constant 0 : index
    %6 = vector.load %arg3[%c3, %c0_6, %c0_7] : memref<4x32x32xf32, #tpu.memory_space<vmem>>, vector<1x6x8xf32>
    %7 = vector.shape_cast %6 : vector<1x6x8xf32> to vector<6x8xf32>
    %c0_8 = arith.constant 0 : index
    %c0_9 = arith.constant 0 : index
    %c0_10 = arith.constant 0 : index
    %8 = vector.load %arg4[%c0_8, %c0_9, %c0_10] : memref<4x32x1xf32, #tpu.memory_space<vmem>>, vector<1x32x1xf32>
    %9 = vector.shape_cast %8 : vector<1x32x1xf32> to vector<32x1xf32>
    %c1_11 = arith.constant 1 : index
    %c0_12 = arith.constant 0 : index
    %c0_13 = arith.constant 0 : index
    %10 = vector.load %arg4[%c1_11, %c0_12, %c0_13] : memref<4x32x1xf32, #tpu.memory_space<vmem>>, vector<1x16x1xf32>
    %11 = vector.shape_cast %10 : vector<1x16x1xf32> to vector<16x1xf32>
    %c2_14 = arith.constant 2 : index
    %c0_15 = arith.constant 0 : index
    %c0_16 = arith.constant 0 : index
    %12 = vector.load %arg4[%c2_14, %c0_15, %c0_16] : memref<4x32x1xf32, #tpu.memory_space<vmem>>, vector<1x8x1xf32>
    %13 = vector.shape_cast %12 : vector<1x8x1xf32> to vector<8x1xf32>
    %c3_17 = arith.constant 3 : index
    %c0_18 = arith.constant 0 : index
    %c0_19 = arith.constant 0 : index
    %14 = vector.load %arg4[%c3_17, %c0_18, %c0_19] : memref<4x32x1xf32, #tpu.memory_space<vmem>>, vector<1x6x1xf32>
    %15 = vector.shape_cast %14 : vector<1x6x1xf32> to vector<6x1xf32>
    %c0_20 = arith.constant 0 : index
    %c0_21 = arith.constant 0 : index
    %c0_22 = arith.constant 0 : index
    %16 = vector.load %arg2[%c0_20, %c0_21, %c0_22] : memref<1x32x256xf32, #tpu.memory_space<vmem>>, vector<1x32x256xf32>
    %17 = vector.shape_cast %16 : vector<1x32x256xf32> to vector<32x256xf32>
    %cst = arith.constant dense<0.000000e+00> : vector<32x256xf32>
    %18 = tpu.matmul %1, %17, %cst {dimension_numbers = #tpu.dot_dimension_numbers<[1], [0], [0], [1], [0, 0, 1, 1], [], []>} : vector<32x32xf32>, vector<32x256xf32>, vector<32x256xf32> -> vector<32x256xf32>
    %19 = vector.broadcast %9 : vector<32x1xf32> to vector<32x256xf32>
    %20 = arith.addf %18, %19 : vector<32x256xf32>
    %cst_23 = arith.constant 0.000000e+00 : f32
    %21 = vector.broadcast %cst_23 : f32 to vector<32x256xf32>
    %22 = arith.maximumf %20, %21 : vector<32x256xf32>
    %cst_24 = arith.constant dense<0.000000e+00> : vector<16x256xf32>
    %23 = tpu.matmul %3, %22, %cst_24 {dimension_numbers = #tpu.dot_dimension_numbers<[1], [0], [0], [1], [0, 0, 1, 1], [], []>} : vector<16x32xf32>, vector<32x256xf32>, vector<16x256xf32> -> vector<16x256xf32>
    %24 = vector.broadcast %11 : vector<16x1xf32> to vector<16x256xf32>
    %25 = arith.addf %23, %24 : vector<16x256xf32>
    %cst_25 = arith.constant 0.000000e+00 : f32
    %26 = vector.broadcast %cst_25 : f32 to vector<16x256xf32>
    %27 = arith.maximumf %25, %26 : vector<16x256xf32>
    %cst_26 = arith.constant dense<0.000000e+00> : vector<8x256xf32>
    %28 = tpu.matmul %5, %27, %cst_26 {dimension_numbers = #tpu.dot_dimension_numbers<[1], [0], [0], [1], [0, 0, 1, 1], [], []>} : vector<8x16xf32>, vector<16x256xf32>, vector<8x256xf32> -> vector<8x256xf32>
    %29 = vector.broadcast %13 : vector<8x1xf32> to vector<8x256xf32>
    %30 = arith.addf %28, %29 : vector<8x256xf32>
    %cst_27 = arith.constant 0.000000e+00 : f32
    %31 = vector.broadcast %cst_27 : f32 to vector<8x256xf32>
    %32 = arith.maximumf %30, %31 : vector<8x256xf32>
    %cst_28 = arith.constant dense<0.000000e+00> : vector<6x256xf32>
    %33 = tpu.matmul %7, %32, %cst_28 {dimension_numbers = #tpu.dot_dimension_numbers<[1], [0], [0], [1], [0, 0, 1, 1], [], []>} : vector<6x8xf32>, vector<8x256xf32>, vector<6x256xf32> -> vector<6x256xf32>
    %34 = vector.broadcast %15 : vector<6x1xf32> to vector<6x256xf32>
    %35 = arith.addf %33, %34 : vector<6x256xf32>
    %36 = vector.extract_strided_slice %35 {offsets = [0, 0], sizes = [3, 256], strides = [1, 1]} : vector<6x256xf32> to vector<3x256xf32>
    %c0_29 = arith.constant 0 : index
    %c0_30 = arith.constant 0 : index
    %c0_31 = arith.constant 0 : index
    %37 = vector.load %arg5[%c0_29, %c0_30, %c0_31] : memref<1x3x256xf32, #tpu.memory_space<vmem>>, vector<1x3x256xf32>
    %38 = vector.shape_cast %37 : vector<1x3x256xf32> to vector<3x256xf32>
    %39 = vector.shape_cast %36 : vector<3x256xf32> to vector<1x3x256xf32>
    tpu.vector_store %arg5[%c0_29, %c0_30, %c0_31], %39 {strides = array<i32>} : memref<1x3x256xf32, #tpu.memory_space<vmem>>, vector<1x3x256xf32>,
    %40 = vector.extract_strided_slice %35 {offsets = [3, 0], sizes = [3, 256], strides = [1, 1]} : vector<6x256xf32> to vector<3x256xf32>
    %c0_32 = arith.constant 0 : index
    %c0_33 = arith.constant 0 : index
    %c0_34 = arith.constant 0 : index
    %41 = vector.load %arg6[%c0_32, %c0_33, %c0_34] : memref<1x3x256xf32, #tpu.memory_space<vmem>>, vector<1x3x256xf32>
    %42 = vector.shape_cast %41 : vector<1x3x256xf32> to vector<3x256xf32>
    %43 = vector.shape_cast %40 : vector<3x256xf32> to vector<1x3x256xf32>
    tpu.vector_store %arg6[%c0_32, %c0_33, %c0_34], %43 {strides = array<i32>} : memref<1x3x256xf32, #tpu.memory_space<vmem>>, vector<1x3x256xf32>,
    return
  }
  func.func @transform_0(%arg0: i32, %arg1: i32) -> (i32, i32, i32) {
    %c0_i32 = arith.constant 0 : i32
    %c0_i32_0 = arith.constant 0 : i32
    return %arg0, %c0_i32, %arg1 : i32, i32, i32
  }
  func.func @transform_1(%arg0: i32, %arg1: i32) -> (i32, i32, i32) {
    %c0_i32 = arith.constant 0 : i32
    %c0_i32_0 = arith.constant 0 : i32
    %c0_i32_1 = arith.constant 0 : i32
    %c0_i32_2 = arith.constant 0 : i32
    return %c0_i32, %c0_i32_0, %c0_i32_1 : i32, i32, i32
  }
  func.func @transform_2(%arg0: i32, %arg1: i32) -> (i32, i32, i32) {
    %c0_i32 = arith.constant 0 : i32
    %c0_i32_0 = arith.constant 0 : i32
    %c0_i32_1 = arith.constant 0 : i32
    %c0_i32_2 = arith.constant 0 : i32
    return %c0_i32, %c0_i32_0, %c0_i32_1 : i32, i32, i32
  }
  func.func @transform_3(%arg0: i32, %arg1: i32) -> (i32, i32, i32) {
    %c0_i32 = arith.constant 0 : i32
    %c0_i32_0 = arith.constant 0 : i32
    return %arg0, %c0_i32, %arg1 : i32, i32, i32
  }
  func.func @transform_4(%arg0: i32, %arg1: i32) -> (i32, i32, i32) {
    %c0_i32 = arith.constant 0 : i32
    %c0_i32_0 = arith.constant 0 : i32
    return %arg0, %c0_i32, %arg1 : i32, i32, i32
  }
}

</mosaic_0001>

<bundles_post_ra>
// kernel: tpu_custom_call.1
= control target key start
LH: loop header
LB: loop body
LE: loop exit
PB: predicated region body
PF: predicated region fallthrough
CT: control target
= control target key end

     0   :  { %10 = vsyncpa [#allocation3], 0  ;;  %s1015_s15 = smov 0   ;;  %s1017_s16 = smov 0   ;;  %s1119_s0 = inlined_call_operand.vmem [shape: f32[2,32,256], index: 0, kind: input, shape index: {}]   ;;  %s1120_s1 = inlined_call_operand.hbm [shape: f32[4,32,32], index: 1, kind: input, shape index: {}]   ;;  %s1121_s2 = inlined_call_operand.vmem [shape: f32[4,32,1], index: 2, kind: input, shape index: {}]   ;;  %s1122_s3 = inlined_call_operand.vmem [shape: f32[2,3,256], index: 3, kind: output, shape index: {0}]   ;;  %s1123_s4 = inlined_call_operand.vmem [shape: f32[2,3,256], index: 4, kind: output, shape index: {1}]  }
   0x1   :  { %s1019_s17 = smov 0  }
   0x2 LB: > { %s859_s18 = sadd.s32 4294967295, %s983_s17   ;;  %s28_s19 = sadd.s32 1, %s979_s16  ;;  %s983_s17 = sphi %s1019_s17, %s16_s17   ;;  %s979_s16 = sphi %s1017_s16, %s1127_s16   ;;  %s975_s15 = sphi %s1015_s15, %s1126_s15  }
   0x3   : > { %p30_p0 = scmp.ge.s32.totalorder %s28_s19, 2  ;;  %p861_p1 = scmp.ge.s32.totalorder %s983_s17, 1 }
   0x4   : > { %p159_p2 = scmp.lt.s32.totalorder %s983_s17, 3  ;;  %p1040_p4 = scmp.eq.s32.totalorder %s859_s18, 0 }
   0x5   : > { %s1129_s19 = smov (%p30_p0, %s28_s19), 0  ;;  %s985_s22 = smov [#allocation2]  }
   0x6   : > { %p1036_p3 = pnand %p861_p1, %p159_p2  ;;  %s171_s23 = sshll.u32 %s985_s22, 4  ;;  %s172_s23 = int_to_ptr.vmem [resolvable:$true] %s171_s23 }
   0x7   : > { %s942_s24 = scalar_lea.vmem %s172_s23, 2048  ;;  %p950_p11 = scmp.lt.s32.totalorder %s172_s23, %s172_s23 }
   0x8   : > { %p894_p5 = pneg %p1036_p3  ;;  %p943_p8 = scmp.ne.s32.totalorder %s172_s23, %s942_s24 }
   0x9   : > { %p951_p12 = scmp.lt.s32.totalorder %s942_s24, %s942_s24 }
   0xa   : > { %p895_p6 = pnand %p1040_p4, %p894_p5 }
   0xb   : > { %p952_p13 = por %p951_p12, %p950_p11 }
   0xc   : > { %p933_p7 = pneg %p895_p6 }
   0xe   : > { %p945_p9 = pnand %p943_p8, %p933_p7 }
  0x10   : > { %p946_p10 = pneg %p945_p9 }
  0x12   : > { %p953_p0 = pnand %p952_p13, %p946_p10 }
  0x14   : > { %956 = shalt.err (!%p953_p0)
}
  0x15   : > { %s986_s25 = smov 128   ;;  %s987_s26 = smov 8  }
  0x16   : > { %897 = dma.hbm_to_vmem [thread:$0]  (!%p895_p6), %s1120_s1, 2048, %s172_s23, [#allocation3], %s986_s25, %s986_s25, %s987_s26  }
  0x17   : > { %203 = sbr.rel (%p1036_p3) target bundleno = 873 (0x369), region = 32 }
  0x1c   : > { %970 = dma.done.wait (%p1040_p4), [#allocation3], 2048  }
  0x1d   : > { %972 = vsyncadd (%p1040_p4), [#allocation3], 4294965248  ;;  %p247_p1 = scmp.lt.s32.totalorder %s975_s15, 1  ;;  %v988_v0 = vmov 0.0   ;;  %v989_v1 = vmov 0   ;;  %v288_v9 = vld [vmem:[%s1121_s2 + $0x8] sm:$0xff] }
  0x1e   : > { %403 = vmatprep.mubr.f32.mxu0 %v988_v0  ;;  %930 = vset.pattern.permute.xlu1 %v989_v1  ;;  %v290_v10 = vld [vmem:[%s1121_s2 + $0x18] sm:$0xff]  ;;  %v276_v12 = vld [vmem:[#allocation2] sm:$0xff]  ;;  %vm326_vm0 = vcmask 261120   ;;  %v289_v14 = vld [vmem:[%s1121_s2 + $0x10] sm:$0xff]  ;;  %vm538_vm1 = vcmask 130048   ;;  %vm620_vm2 = vcmask 64512  }
  0x1f   : > { %s1131_s15 = smov (!%p247_p1, %s975_s15), 1  ;;  %929 = vset.pattern.permute.xlu0 %v989_v1  ;;  %516 = vmatprep.mubr.f32.mxu1 %v988_v0  ;;  %v287_v13 = vld [vmem:[%s1121_s2] sm:$0xff]  ;;  %v277_v15 = vld [vmem:[#allocation2 + $0x8] sm:$0xff]  ;;  %v278_v18 = vld [vmem:[#allocation2 + $0x10] sm:$0xff]  ;;  %vm701_vm3 = vcmask 1040384   ;;  %vm702_vm4 = vcmask 1044484  }
  0x20   : > { %s887_s29 = sshll.u32 %s1131_s15, 6  ;;  %313 = vperm.xlu1 %930, %v288_v9   ;;  %323 = vperm.xlu0 %929, %v290_v10   ;;  %v872_v16 = vld [vmem:[%s1121_s2 + $0x20] sm:$0xff]  ;;  %v873_v17 = vld [vmem:[%s1121_s2 + $0x28] sm:$0xff]  ;;  %v279_v21 = vld [vmem:[#allocation2 + $0x18] sm:$0xff]  ;;  %s888_s27 = sshll.u32 %s1131_s15, 3 }
  0x21   : > { %s254_s6 = scalar_lea.vmem %s1119_s0, %s887_s29  ;;  %v875_v19 = vld [vmem:[%s1121_s2 + $0x60] sm:$0x3f]  ;;  %v282_v51 = vld [vmem:[#allocation2 + $0x28] sm:$0xff]  ;;  %s264_s30 = scalar_lea.vmem %s1122_s3, %s888_s27  ;;  %vm703_vm5 = vmor %vm701_vm3, %vm702_vm4 }
  0x22   : > { %v305_v2 = vld [vmem:[%s254_s6 + $0x38] sm:$0xff]  ;;  %v304_v3 = vld [vmem:[%s254_s6 + $0x30] sm:$0xff]  ;;  %v303_v4 = vld [vmem:[%s254_s6 + $0x28] sm:$0xff]  ;;  %s274_s7 = scalar_lea.vmem %s1123_s4, %s888_s27 }
  0x23   : > { %363 = vmatprep.subr.mxu0 %v305_v2  ;;  %v302_v5 = vld [vmem:[%s254_s6 + $0x20] sm:$0xff]  ;;  %v301_v6 = vld [vmem:[%s254_s6 + $0x18] sm:$0xff]  ;;  %v300_v7 = vld [vmem:[%s254_s6 + $0x10] sm:$0xff] }
  0x24   : > { %364 = vmatpush1.msra.mxu0 %v304_v3  ;;  %v299_v8 = vld [vmem:[%s254_s6 + $0x8] sm:$0xff]  ;;  %v298_v11 = vld [vmem:[%s254_s6] sm:$0xff]  ;;  %308 = vperm.xlu1 %930, %v287_v13  }
  0x25   : > { %365 = vmatprep.subr.mxu0 %v303_v4  ;;  %318 = vperm.xlu0 %929, %v289_v14   ;;  %v874_v20 = vld [vmem:[%s1121_s2 + $0x40] sm:$0xff] }
  0x26   : > { %366 = vmatpush1.msra.mxu0 %v302_v5  ;;  %v281_v50 = vld [vmem:[#allocation2 + $0x20] sm:$0xff] }
  0x27   : > { %367 = vmatprep.subr.mxu0 %v301_v6  ;;  %v284_v3 = vld [vmem:[#allocation2 + $0x40] sm:$0xff] }
  0x28   : > { %368 = vmatpush1.msra.mxu0 %v300_v7  ;;  %438 = vperm.xlu1 %930, %v872_v16  }
  0x29   : > { %369 = vmatprep.subr.mxu0 %v299_v8  ;;  %443 = vperm.xlu0 %929, %v873_v17  }
  0x2a   : > { %370 = vmatpush1.msra.mxu0 %v298_v11  ;;  %v286_v11 = vld [vmem:[#allocation2 + $0x60] sm:$0x3f] }
  0x2b   : > { %876 = vmatmul.mubr.msk.f32.vlgmr.msra.gmra.mxu0 %vm326_vm0, %v276_v12 }
  0x2c   : > { %409 = vmatprep.mubr.f32.mxu0 %v988_v0  ;;  %617 = vperm.xlu1 %930, %v875_v19  }
  0x2d   : > { %535 = vperm.xlu0 %929, %v874_v20  }
  0x2f   : > { %877 = vmatmul.mubr.msk.f32.gmra.mxu0 %vm326_vm0, %v277_v15 }
  0x30   : > { %415 = vmatprep.mubr.f32.mxu0 %v988_v0 }
  0x33   : > { %878 = vmatmul.mubr.msk.f32.gmra.mxu0 %vm326_vm0, %v278_v18 }
  0x34   : > { %421 = vmatprep.mubr.f32.mxu0 %v988_v0 }
  0x37   : > { %879 = vmatmul.mubr.msk.f32.gmra.mxu0 %vm326_vm0, %v279_v21 }
  0x9b   : > { %v324_v26 = vpop.permute.xlu0 %323  ;;  %v314_v29 = vpop.permute.xlu1 %313 }
  0x9f   : > { %v309_v37 = vpop.permute.xlu1 %308 }
  0xa0   : > { %v319_v31 = vpop.permute.xlu0 %318 }
  0xa3   : > { %v439_v56 = vpop.permute.xlu1 %438 }
  0xa4   : > { %v444_v55 = vpop.permute.xlu0 %443 }
  0xa7   : > { %v618_v13 = vpop.permute.xlu1 %617 }
  0xa8   : > { %v536_v5 = vpop.permute.xlu0 %535 }
  0xeb   : > { %v405_v22 = vpop.f32.mrf.mxu0 }
  0xec   : > { %v406_v44 = vadd.f32 %v405_v22, %v309_v37 }
  0xed   : > { %v407_v23 = vpop.f32.mrf.mxu0 }
  0xee   : > { %v408_v42 = vadd.f32 %v407_v23, %v309_v37  ;;  %v428_v49 = vmax.f32 %v406_v44, 0.0 }
  0xef   : > { %v411_v24 = vpop.f32.mrf.mxu0 }
  0xf0   : > { %v412_v40 = vadd.f32 %v411_v24, %v314_v29  ;;  %v429_v48 = vmax.f32 %v408_v42, 0.0 }
  0xf1   : > { %v413_v25 = vpop.f32.mrf.mxu0 }
  0xf2   : > { %v414_v38 = vadd.f32 %v413_v25, %v314_v29  ;;  %v430_v47 = vmax.f32 %v412_v40, 0.0 }
  0xf3   : > { %v417_v27 = vpop.f32.mrf.mxu0 }
  0xf4   : > { %v418_v36 = vadd.f32 %v417_v27, %v319_v31  ;;  %v431_v46 = vmax.f32 %v414_v38, 0.0 }
  0xf5   : > { %v419_v28 = vpop.f32.mrf.mxu0 }
  0xf6   : > { %v420_v34 = vadd.f32 %v419_v28, %v319_v31  ;;  %v432_v45 = vmax.f32 %v418_v36, 0.0 }
  0xf7   : > { %v423_v30 = vpop.f32.mrf.mxu0 }
  0xf8   : > { %v424_v32 = vadd.f32 %v423_v30, %v324_v26  ;;  %v433_v43 = vmax.f32 %v420_v34, 0.0 }
  0xf9   : > { %v425_v33 = vpop.f32.mrf.mxu0 }
  0xfa   : > { %v426_v35 = vadd.f32 %v425_v33, %v324_v26  ;;  %v434_v41 = vmax.f32 %v424_v32, 0.0 }
  0xfc   : > { %v435_v39 = vmax.f32 %v426_v35, 0.0 }
  0xfe   : > { %476 = vmatprep.subr.mxu1 %v435_v39 }
  0xff   : > { %477 = vmatpush1.msra.mxu1 %v434_v41 }
 0x100   : > { %478 = vmatprep.subr.mxu1 %v433_v43 }
 0x101   : > { %479 = vmatpush1.msra.mxu1 %v432_v45 }
 0x102   : > { %480 = vmatprep.subr.mxu1 %v431_v46 }
 0x103   : > { %481 = vmatpush1.msra.mxu1 %v430_v47 }
 0x104   : > { %482 = vmatprep.subr.mxu1 %v429_v48 }
 0x105   : > { %483 = vmatpush1.msra.mxu1 %v428_v49 }
 0x106   : > { %880 = vmatmul.mubr.msk.f32.vlgmr.msra.gmra.mxu1 %vm326_vm0, %v281_v50 }
 0x107   : > { %522 = vmatprep.mubr.f32.mxu1 %v988_v0 }
 0x10a   : > { %881 = vmatmul.mubr.msk.f32.gmra.mxu1 %vm326_vm0, %v282_v51 }
 0x10b   : > { %606 = vmatprep.mubr.f32.mxu1 %v988_v0 }
 0x1c6   : > { %v518_v52 = vpop.f32.mrf.mxu1 }
 0x1c7   : > { %v519_v61 = vadd.f32 %v518_v52, %v439_v56 }
 0x1c8   : > { %v520_v53 = vpop.f32.mrf.mxu1 }
 0x1c9   : > { %v521_v59 = vadd.f32 %v520_v53, %v439_v56  ;;  %v529_v2 = vmax.f32 %v519_v61, 0.0 }
 0x1ca   : > { %v524_v54 = vpop.f32.mrf.mxu1 }
 0x1cb   : > { %v525_v57 = vadd.f32 %v524_v54, %v444_v55  ;;  %v530_v1 = vmax.f32 %v521_v59, 0.0 }
 0x1cc   : > { %v526_v58 = vpop.f32.mrf.mxu1 }
 0x1cd   : > { %v527_v60 = vadd.f32 %v526_v58, %v444_v55  ;;  %v531_v63 = vmax.f32 %v525_v57, 0.0 }
 0x1cf   : > { %v532_v62 = vmax.f32 %v527_v60, 0.0 }
 0x1d1   : > { %570 = vmatprep.subr.mxu1 %v532_v62 }
 0x1d2   : > { %571 = vmatpush1.msra.mxu1 %v531_v63 }
 0x1d3   : > { %572 = vmatprep.subr.mxu1 %v530_v1 }
 0x1d4   : > { %573 = vmatpush1.msra.mxu1 %v529_v2 }
 0x1d5   : > { %882 = vmatmul.mubr.msk.f32.vlgmr.msra.gmra.mxu1 %vm538_vm1, %v284_v3 }
 0x1d6   : > { %688 = vmatprep.mubr.f32.mxu1 %v988_v0 }
 0x295   : > { %v608_v4 = vpop.f32.mrf.mxu1 }
 0x296   : > { %v609_v6 = vadd.f32 %v608_v4, %v536_v5 }
 0x297   : > { %v610_v7 = vpop.f32.mrf.mxu1 }
 0x298   : > { %v611_v8 = vadd.f32 %v610_v7, %v536_v5  ;;  %v613_v10 = vmax.f32 %v609_v6, 0.0 }
 0x29a   : > { %v614_v9 = vmax.f32 %v611_v8, 0.0 }
 0x29c   : > { %654 = vmatprep.subr.mxu1 %v614_v9 }
 0x29d   : > { %655 = vmatpush1.msra.mxu1 %v613_v10 }
 0x29e   : > { %883 = vmatmul.mubr.msk.f32.vlgmr.msra.gmra.mxu1 %vm620_vm2, %v286_v11 }
 0x35e   : > { %v690_v12 = vpop.f32.mrf.mxu1 }
 0x35f   : > { %v691_v15 = vadd.f32 %v690_v12, %v618_v13 }
 0x360   : > { %v692_v14 = vpop.f32.mrf.mxu1 }
 0x361   : > { %v693_v16 = vadd.f32 %v692_v14, %v618_v13 }
 0x363   : > { %v697_v0 = vcombine.low %v691_v15, %v693_v16  ;;  %v700_v17 = vcombine.high %v691_v15, %v693_v16 }
 0x365   : > { %699 = vst [vmem:[%s264_s30] sm:$0x77] %v697_v0  ;;  %v884_v18 = vrot.slane %v697_v0, 11  ;;  %v706_v19 = vrot.slane %v700_v17, 7 }
 0x367   : > { %v707_v20 = vsel %vm703_vm5, %v884_v18, %v706_v19 }
 0x368   : > { %709 = vst [vmem:[%s274_s7] sm:$0x77] %v707_v20 }
 0x369 PF: > { %s16_s17 = sadd.s32 1, %s983_s17   ;;  %s1126_s15 = smov %s979_s16 }
 0x36a   : > { %p13_p2 = scmp.ge.s32.totalorder %s16_s17, 4   ;;  %s1127_s16 = smov %s1129_s19 }
 0x36c   :  { %15 = sbr.rel (!%p13_p2) target bundleno = 2 (0x2), region = 85 }
 0x371   :  { %765 = vsyncpa [#allocation3], 1 }
 0x372   :  { %767 = vsyncpa [#allocation3 + $0x1], 1 }

</bundles_post_ra>
